<compile_context>
chip_gen: v7x
topology: tpu7x:2x2x1
jax: 0.10.0
libtpu: 0.0.40
codegen_flags: <defaults>
</compile_context>

<pallas_src>
import jax
import jax.numpy as jnp
from jax.experimental import pallas as pl
from jax.experimental.pallas import tpu as pltpu

KH = KW = 3   # ConvBlock defaults: kernel_size=3, stride=1, padding=1
LANE = 128


def conv_block_kernel(p_ref, w_ref, b_ref, alpha_ref, o_ref):
    """One M-tile of the im2col GEMM, fused with bias + PReLU.

    p_ref:     (MT, K)      im2col patches tile, K = KH*KW*Cin
    w_ref:     (K, CP)      conv weights as GEMM matrix, Cout zero-padded to CP=128
    b_ref:     (1, CP)      conv bias, zero-padded to CP
    alpha_ref: (1,) SMEM    shared PReLU slope (torch.nn.PReLU() default: 1 param)
    o_ref:     (MT, CP)     lane-dense output tile
    """
    acc = jnp.dot(p_ref[...], w_ref[...], preferred_element_type=jnp.float32)
    acc = acc + b_ref[...]
    alpha = alpha_ref[0]
    # PReLU: x if x >= 0 else alpha * x   (norm=None branch of ConvBlock)
    o_ref[...] = jnp.where(acc >= 0, acc, alpha * acc).astype(o_ref.dtype)


def conv_block_forward(x_nchw, weight_oihw, bias, prelu_alpha):
    """ConvBlock.forward(x) with norm=None, activation='prelu' (PyTorch semantics)."""
    N, Cin, H, W = x_nchw.shape
    Cout = weight_oihw.shape[0]
    K = KH * KW * Cin
    CP = ((Cout + LANE - 1) // LANE) * LANE  # pad channels to full 128-lane width

    # ---- layout plumbing (wrapper side; fused by XLA, negligible here) ------
    # NCHW -> NHWC, spatial zero-pad of 1, im2col rows in (kh, kw, cin) order.
    x_nhwc = jnp.transpose(x_nchw, (0, 2, 3, 1))
    x_pad = jnp.pad(x_nhwc, ((0, 0), (1, 1), (1, 1), (0, 0)))
    patches = jnp.stack(
        [x_pad[:, kh:kh + H, kw:kw + W, :] for kh in range(KH) for kw in range(KW)],
        axis=3)                                   # (N, H, W, KH*KW, Cin)
    patches = patches.reshape(N * H * W, K)       # (M, K)

    # Weight OIHW -> (KH, KW, Cin, Cout) -> (K, Cout), zero-pad Cout -> 128 lanes.
    w_mat = jnp.transpose(weight_oihw, (2, 3, 1, 0)).reshape(K, Cout)
    w_mat = jnp.pad(w_mat, ((0, 0), (0, CP - Cout)))
    b_mat = jnp.pad(bias.reshape(1, Cout), ((0, 0), (0, CP - Cout)))
    alpha = prelu_alpha.reshape(1).astype(x_nchw.dtype)

    M = N * H * W
    # Two M-tiles -> a "parallel" grid axis of extent 2 (v7x has 2 TCs/chip);
    # per-step overhead (~0.35 us) is negligible, and everything fits VMEM.
    grid_m = 2 if (M % 16 == 0) else 1
    MT = M // grid_m

    out = pl.pallas_call(
        conv_block_kernel,
        out_shape=jax.ShapeDtypeStruct((M, CP), x_nchw.dtype),
        grid_spec=pltpu.PrefetchScalarGridSpec(
            num_scalar_prefetch=0,
            grid=(grid_m,),
            in_specs=[
                pl.BlockSpec((MT, K), lambda m: (m, 0)),
                pl.BlockSpec((K, CP), lambda m: (0, 0)),
                pl.BlockSpec((1, CP), lambda m: (0, 0)),
                pl.BlockSpec(memory_space=pltpu.MemorySpace.SMEM),
            ],
            out_specs=pl.BlockSpec((MT, CP), lambda m: (m, 0)),
        ),
        compiler_params=pltpu.CompilerParams(
            dimension_semantics=("parallel",)),
    )(patches, w_mat, b_mat, alpha)

    # Drop padded channels, restore PyTorch's NCHW convention.
    out = out[:, :Cout].reshape(N, H, W, Cout)
    return jnp.transpose(out, (0, 3, 1, 2))


if __name__ == "__main__":
    # Small shapes consistent with the module: N=2, Cin=4, Cout=8, H=W=16.
    N, Cin, Cout, H, W = 2, 4, 8, 16, 16

    key = jax.random.PRNGKey(0)
    kx, kw_, kb = jax.random.split(key, 3)

    x = jax.random.normal(kx, (N, Cin, H, W), dtype=jnp.float32)
    # Deterministic synthetic parameters (shapes from Conv2d(4, 8, 3) + PReLU()).
    fan_in = Cin * KH * KW
    bound = 1.0 / (fan_in ** 0.5)
    weight = jax.random.uniform(kw_, (Cout, Cin, KH, KW), jnp.float32,
                                minval=-bound, maxval=bound)
    bias = jax.random.uniform(kb, (Cout,), jnp.float32,
                              minval=-bound, maxval=bound)
    prelu_alpha = jnp.array(0.25, dtype=jnp.float32)  # torch PReLU default init

    out = conv_block_forward(x, weight, bias, prelu_alpha)
    out = jax.block_until_ready(out)

    # Reference (plain JAX) for sanity.
    ref = jax.lax.conv_general_dilated(
        x, weight, window_strides=(1, 1), padding=((1, 1), (1, 1)),
        dimension_numbers=("NCHW", "OIHW", "NCHW"))
    ref = ref + bias.reshape(1, Cout, 1, 1)
    ref = jnp.where(ref >= 0, ref, prelu_alpha * ref)

    assert out.shape == (N, Cout, H, W)
    assert jnp.allclose(out, ref, atol=1e-4, rtol=1e-4)
    print("KERNEL_OK")
</pallas_src>

<mosaic_0001>
module attributes {stable_mosaic.version = 11 : i64} {
  func.func @conv_block_kernel(%arg0: i32, %arg1: memref<256x36xf32, #tpu.memory_space<vmem>>, %arg2: memref<36x128xf32, #tpu.memory_space<vmem>>, %arg3: memref<1x128xf32, #tpu.memory_space<vmem>>, %arg4: memref<1xf32, #tpu.memory_space<smem>>, %arg5: memref<256x128xf32, #tpu.memory_space<vmem>>) attributes {dimension_semantics = [#tpu.dimension_semantics<parallel>], iteration_bounds = array<i64: 2>, scalar_prefetch = 0 : i64, scratch_operands = 0 : i64, tpu.core_type = #tpu.core_type<tc>, window_params = [{transform_indices = @transform_0, window_bounds = array<i64: 256, 36>}, {pipeline_mode = #tpu.pipeline_mode<synchronous>, transform_indices = @transform_1, window_bounds = array<i64: 36, 128>}, {pipeline_mode = #tpu.pipeline_mode<synchronous>, transform_indices = @transform_2, window_bounds = array<i64: 1, 128>}, {transform_indices = @transform_3, window_bounds = array<i64: 1>}, {transform_indices = @transform_4, window_bounds = array<i64: 256, 128>}]} {
    %c0 = arith.constant 0 : index
    %c0_0 = arith.constant 0 : index
    %0 = vector.load %arg1[%c0, %c0_0] : memref<256x36xf32, #tpu.memory_space<vmem>>, vector<256x36xf32>
    %c0_1 = arith.constant 0 : index
    %c0_2 = arith.constant 0 : index
    %1 = vector.load %arg2[%c0_1, %c0_2] : memref<36x128xf32, #tpu.memory_space<vmem>>, vector<36x128xf32>
    %cst = arith.constant dense<0.000000e+00> : vector<256x128xf32>
    %2 = tpu.matmul %0, %1, %cst {dimension_numbers = #tpu.dot_dimension_numbers<[1], [0], [0], [1], [0, 0, 1, 1], [], []>} : vector<256x36xf32>, vector<36x128xf32>, vector<256x128xf32> -> vector<256x128xf32>
    %c0_3 = arith.constant 0 : index
    %c0_4 = arith.constant 0 : index
    %3 = vector.load %arg3[%c0_3, %c0_4] : memref<1x128xf32, #tpu.memory_space<vmem>>, vector<1x128xf32>
    %4 = vector.broadcast %3 : vector<1x128xf32> to vector<256x128xf32>
    %5 = arith.addf %2, %4 : vector<256x128xf32>
    %c0_5 = arith.constant 0 : index
    %6 = memref.load %arg4[%c0_5] : memref<1xf32, #tpu.memory_space<smem>>
    %cst_6 = arith.constant 0.000000e+00 : f32
    %7 = vector.broadcast %cst_6 : f32 to vector<256x128xf32>
    %8 = arith.cmpf oge, %5, %7 : vector<256x128xf32>
    %9 = vector.broadcast %6 : f32 to vector<256x128xf32>
    %10 = arith.mulf %9, %5 : vector<256x128xf32>
    %11 = arith.select %8, %5, %10 : vector<256x128xi1>, vector<256x128xf32>
    %c0_7 = arith.constant 0 : index
    %c0_8 = arith.constant 0 : index
    %12 = vector.load %arg5[%c0_7, %c0_8] : memref<256x128xf32, #tpu.memory_space<vmem>>, vector<256x128xf32>
    tpu.vector_store %arg5[%c0_7, %c0_8], %11 {strides = array<i32>} : memref<256x128xf32, #tpu.memory_space<vmem>>, vector<256x128xf32>,
    return
  }
  func.func @transform_0(%arg0: i32) -> (i32, i32) {
    %c0_i32 = arith.constant 0 : i32
    %c0_i32_0 = arith.constant 0 : i32
    return %arg0, %c0_i32 : i32, i32
  }
  func.func @transform_1(%arg0: i32) -> (i32, i32) {
    %c0_i32 = arith.constant 0 : i32
    %c0_i32_0 = arith.constant 0 : i32
    %c0_i32_1 = arith.constant 0 : i32
    return %c0_i32, %c0_i32_0 : i32, i32
  }
  func.func @transform_2(%arg0: i32) -> (i32, i32) {
    %c0_i32 = arith.constant 0 : i32
    %c0_i32_0 = arith.constant 0 : i32
    %c0_i32_1 = arith.constant 0 : i32
    return %c0_i32, %c0_i32_0 : i32, i32
  }
  func.func @transform_3(%arg0: i32) -> i32 {
    %c0_i32 = arith.constant 0 : i32
    %c0_i32_0 = arith.constant 0 : i32
    return %c0_i32 : i32
  }
  func.func @transform_4(%arg0: i32) -> (i32, i32) {
    %c0_i32 = arith.constant 0 : i32
    %c0_i32_0 = arith.constant 0 : i32
    return %arg0, %c0_i32 : i32, i32
  }
}

</mosaic_0001>

<bundles_post_ra>
// kernel: tpu_custom_call.1
= control target key start
LH: loop header
LB: loop body
LE: loop exit
PB: predicated region body
PF: predicated region fallthrough
CT: control target
= control target key end

     0   :  { %s1366_s0 = inlined_call_operand.vmem [shape: f32[512,36], index: 0, kind: input, shape index: {}]   ;;  %s1367_s1 = inlined_call_operand.vmem [shape: f32[36,128], index: 1, kind: input, shape index: {}]   ;;  %s1368_s2 = inlined_call_operand.vmem [shape: f32[1,128], index: 2, kind: input, shape index: {}]   ;;  %s1369_s3 = inlined_call_operand.<no memory space> [shape: f32[1], index: 3, kind: input, shape index: {}]   ;;  %s1370_s4 = inlined_call_operand.hbm [shape: f32[512,128], index: 4, kind: output, shape index: {}]  }
   0x1   :  { %9 = sst [smem:[#allocation2]] %s1369_s3 }
   0x2   :  { %10 = vsyncpa [#allocation4], 0 }
   0x3   :  { %12 = vsyncpa [#allocation4 + $0x1], 0  ;;  %s1068_s17 = smov 0   ;;  %s1070_s18 = smov 0  }
   0x4   :  { %s1072_s19 = smov 0   ;;  %s1074_s20 = smov 0  }
   0x5 LB: > { %s1089_s3 = sadd.s32 4294967295, %s1035_s20   ;;  %s776_s21 = sadd.s32 4294967294, %s1035_s20   ;;  %s1035_s20 = sphi %s1074_s20, %s1376_s20   ;;  %s1031_s19 = sphi %s1072_s19, %s1375_s19   ;;  %s1027_s18 = sphi %s1070_s18, %s1374_s18   ;;  %s1023_s17 = sphi %s1068_s17, %s1373_s17  }
   0x6   : > { %s1093_s22 = sadd.s32 1, %s1035_s20   ;;  %s114_s23 = sadd.s32 1, %s1031_s19 }
   0x7   : > { %s111_s24 = ssub.s32 %s1035_s20, %s1093_s22  ;;  %p124_p0 = scmp.ne.s32.totalorder %s1031_s19, %s1027_s18 }
   0x8   : > { %p112_p1 = scmp.eq.s32.totalorder %s111_s24, 0  ;;  %p125_p2 = scmp.eq.s32.totalorder %s1089_s3, 1 }
   0x9   : > { %p130_p3 = scmp.ne.s32.totalorder %s1027_s18, %s1023_s17  ;;  %p131_p4 = scmp.eq.s32.totalorder %s776_s21, 1 }
   0xa   : > { %s1104_s25 = scalar_select %p112_p1, %s1031_s19, %s114_s23  }
   0xb   : > { %p1106_p5 = por %p125_p2, %p124_p0  ;;  %p1110_p6 = por %p131_p4, %p130_p3 }
   0xc   : > { %p779_p7 = scmp.ge.s32.totalorder %s1035_s20, 1  ;;  %p167_p8 = scmp.lt.s32.totalorder %s1035_s20, 3 }
   0xe   : > { %p168_p9 = pnand %p779_p7, %p167_p8 }
   0xf   : > { %v232_v0 = vld [vmem:[%s1367_s1] sm:$0xff] (!%p168_p9)  ;;  %v233_v1 = vld [vmem:[%s1367_s1 + $0x8] sm:$0xff] (!%p168_p9)  ;;  %v234_v2 = vld [vmem:[%s1367_s1 + $0x10] sm:$0xff] (!%p168_p9)  ;;  %s781_s8 = sshll.u32 (!%p168_p9), %s1089_s3, 5  ;;  %vm341_vm0 = vcmask (!%p168_p9), 1043456   ;;  %vm244_vm1 = vcmask (!%p168_p9), 293888  }
  0x10   : > { %171 = sbr.rel (%p168_p9) target bundleno = 291 (0x123), region = 36  ;;  %v918_v3 = vpack.c.bf16 (!%p168_p9), %v233_v1, %v232_v0  ;;  %v235_v4 = vld [vmem:[%s1367_s1 + $0x18] sm:$0xff] (!%p168_p9)  ;;  %p194_p10 = scmp.lt.s32.totalorder (!%p168_p9), %s781_s8, 63  ;;  %v236_v6 = vld [vmem:[%s1367_s1 + $0x20] sm:$0xf] (!%p168_p9) }
  0x11   : > { %v922_v5 = vpack.c.bf16 (!%p168_p9), %v235_v4, %v234_v2  ;;  %s570_s21 = sld [smem:[#allocation2]] (!%p168_p9)  ;;  %s190_s23 = sand.u32 (!%p168_p9), 1, %s1027_s18   ;;  %v1209_v39 = vld [vmem:[%s1368_s2] ss:$0 sm:$0xff] (!%p168_p9) }
  0x12   : > { %919 = vmatprep.subr.bf16.mxu0 (!%p168_p9), %v918_v3  ;;  %926 = vmatprep.subr.bf16.mxu1 (!%p168_p9), %v918_v3  ;;  %s780_s29 = sshll.u32 (!%p168_p9), %s190_s23, 8  ;;  %s822_s5 = sshll.u32 (!%p168_p9), %s1089_s3, 12 }
  0x13   : > { %921 = vmatpush3.bf16.msra.mxu0 (!%p168_p9), %v918_v3  ;;  %929 = vmatpush3.bf16.msra.mxu1 (!%p168_p9), %v918_v3  ;;  %s1225_s30 = scalar_lea.vmem (!%p168_p9), [#allocation3], %s780_s29  ;;  %s1325_s9 = scalar_lea.sflag (!%p168_p9), [#allocation4], %s190_s23 }
  0x14   : > { %923 = vmatprep.subr.bf16.mxu0 (!%p168_p9), %v922_v5  ;;  %927 = vmatprep.subr.bf16.mxu1 (!%p168_p9), %v922_v5  ;;  %s714_s6 = sshll.u32 (!%p168_p9), %s1225_s30, 4  ;;  %s1317_s6 = int_to_ptr.vmem [resolvable:$true] %s714_s6 }
  0x15   : > { %s973_s10 = scalar_lea.vmem (!%p168_p9), %s1317_s6, 4096 }
  0x16   : > { %p974_p11 = scmp.ne.s32.totalorder (!%p168_p9), %s1317_s6, %s973_s10 }
  0x17   : > { %s1378_s8 = smov (!%p194_p10, %s781_s8), 63  ;;  %925 = vmatpush3.bf16.msra.mxu0 %v922_v5  ;;  %930 = vmatpush3.bf16.msra.mxu1 %v922_v5  ;;  %v1213_v41 = vstv %s570_s21 }
  0x18   : > { %s782_s11 = sshll.u32 %s1378_s8, 3  ;;  %868 = vmatprep.subr.msk.mxu0 %vm341_vm0, %v236_v6  ;;  %928 = vmatprep.subr.msk.mxu1 %vm341_vm0, %v236_v6  ;;  %s1315_s8 = scalar_lea.hbm %s1370_s4, %s822_s5 }
  0x19   : > { %s1135_s16 = scalar_lea.vmem %s1366_s0, %s782_s11  ;;  %p975_p12 = pnand %p974_p11, %p1106_p5 }
  0x1a   : > { %v200_v7 = vld [vmem:[%s1135_s16] sm:$0xff]  ;;  %v201_v9 = vld [vmem:[%s1135_s16 + $0x8] sm:$0xff]  ;;  %v202_v11 = vld [vmem:[%s1135_s16 + $0x10] sm:$0xff]  ;;  %s1037_s11 = smov [#allocation3]  }
  0x1b   : > { %v216_v8 = vld [vmem:[%s1135_s16 + $0x80] sm:$0xff]  ;;  %870 = vmatprep.mubr.msk.f32.mxu0 %vm244_vm1, %v200_v7  ;;  %v217_v10 = vld [vmem:[%s1135_s16 + $0x88] sm:$0xff]  ;;  %v218_v12 = vld [vmem:[%s1135_s16 + $0x90] sm:$0xff]  ;;  %869 = vmatpush3.msk.msra.mxu0 %vm341_vm0, %v236_v6  ;;  %p976_p13 = pneg %p975_p12  ;;  %s977_s12 = sshll.u32 %s1037_s11, 4  ;;  %s978_s12 = int_to_ptr.vmem [resolvable:$false] %s977_s12 }
  0x1c   : > { %894 = vmatprep.mubr.msk.f32.mxu1 %vm244_vm1, %v216_v8  ;;  %931 = vmatpush3.msk.msra.mxu1 %vm341_vm0, %v236_v6  ;;  %v203_v13 = vld [vmem:[%s1135_s16 + $0x18] sm:$0xff]  ;;  %v204_v15 = vld [vmem:[%s1135_s16 + $0x20] sm:$0xff]  ;;  %v205_v17 = vld [vmem:[%s1135_s16 + $0x28] sm:$0xff]  ;;  %s979_s13 = scalar_lea.vmem %s978_s12, 8192  ;;  %p980_p0 = scmp.lt.s32.totalorder %s1317_s6, %s978_s12 }
  0x1d   : > { %871 = vmatmul.mubr.msk.f32.vlgmr.msra.gmra.mrb[0].mxu0 %vm244_vm1, %v201_v9  ;;  %895 = vmatmul.mubr.msk.f32.vlgmr.msra.gmra.mrb[0].mxu1 %vm244_vm1, %v217_v10  ;;  %v219_v14 = vld [vmem:[%s1135_s16 + $0x98] sm:$0xff]  ;;  %v220_v16 = vld [vmem:[%s1135_s16 + $0xa0] sm:$0xff]  ;;  %v221_v18 = vld [vmem:[%s1135_s16 + $0xa8] sm:$0xff]  ;;  %p981_p1 = scmp.lt.s32.totalorder %s979_s13, %s973_s10 }
  0x1e   : > { %873 = vmatprep.mubr.msk.f32.mxu0 %vm244_vm1, %v202_v11  ;;  %897 = vmatprep.mubr.msk.f32.mxu1 %vm244_vm1, %v218_v12  ;;  %v206_v19 = vld [vmem:[%s1135_s16 + $0x30] sm:$0xff]  ;;  %v207_v21 = vld [vmem:[%s1135_s16 + $0x38] sm:$0xff]  ;;  %v208_v23 = vld [vmem:[%s1135_s16 + $0x40] sm:$0xff] }
  0x1f   : > { %v222_v20 = vld [vmem:[%s1135_s16 + $0xb0] sm:$0xff]  ;;  %v223_v22 = vld [vmem:[%s1135_s16 + $0xb8] sm:$0xff]  ;;  %v224_v24 = vld [vmem:[%s1135_s16 + $0xc0] sm:$0xff]  ;;  %p982_p2 = por %p981_p1, %p980_p0 }
  0x20   : > { %v209_v25 = vld [vmem:[%s1135_s16 + $0x48] sm:$0xff]  ;;  %v210_v27 = vld [vmem:[%s1135_s16 + $0x50] sm:$0xff]  ;;  %v211_v29 = vld [vmem:[%s1135_s16 + $0x58] sm:$0xff] }
  0x21   : > { %874 = vmatmul.mubr.msk.f32.gmra.mrb[2].mxu0 %vm244_vm1, %v203_v13  ;;  %898 = vmatmul.mubr.msk.f32.gmra.mrb[2].mxu1 %vm244_vm1, %v219_v14  ;;  %v225_v26 = vld [vmem:[%s1135_s16 + $0xc8] sm:$0xff]  ;;  %v226_v28 = vld [vmem:[%s1135_s16 + $0xd0] sm:$0xff]  ;;  %v227_v30 = vld [vmem:[%s1135_s16 + $0xd8] sm:$0xff]  ;;  %p983_p3 = pnand %p982_p2, %p976_p13 }
  0x22   : > { %876 = vmatprep.mubr.msk.f32.mxu0 %vm244_vm1, %v204_v15  ;;  %900 = vmatprep.mubr.msk.f32.mxu1 %vm244_vm1, %v220_v16  ;;  %v212_v31 = vld [vmem:[%s1135_s16 + $0x60] sm:$0xff]  ;;  %v213_v33 = vld [vmem:[%s1135_s16 + $0x68] sm:$0xff]  ;;  %v214_v35 = vld [vmem:[%s1135_s16 + $0x70] sm:$0xff] }
  0x23   : > { %v228_v32 = vld [vmem:[%s1135_s16 + $0xe0] sm:$0xff]  ;;  %v229_v34 = vld [vmem:[%s1135_s16 + $0xe8] sm:$0xff]  ;;  %v230_v36 = vld [vmem:[%s1135_s16 + $0xf0] sm:$0xff] }
  0x24   : > { %v215_v37 = vld [vmem:[%s1135_s16 + $0x78] sm:$0xff] }
  0x25   : > { %877 = vmatmul.mubr.msk.f32.gmra.mrb[4].mxu0 %vm244_vm1, %v205_v17  ;;  %901 = vmatmul.mubr.msk.f32.gmra.mrb[4].mxu1 %vm244_vm1, %v221_v18  ;;  %v231_v38 = vld [vmem:[%s1135_s16 + $0xf8] sm:$0xff] }
  0x26   : > { %879 = vmatprep.mubr.msk.f32.mxu0 %vm244_vm1, %v206_v19  ;;  %903 = vmatprep.mubr.msk.f32.mxu1 %vm244_vm1, %v222_v20 }
  0x29   : > { %880 = vmatmul.mubr.msk.f32.gmra.mrb[6].mxu0 %vm244_vm1, %v207_v21  ;;  %904 = vmatmul.mubr.msk.f32.gmra.mrb[6].mxu1 %vm244_vm1, %v223_v22 }
  0x2a   : > { %882 = vmatprep.mubr.msk.f32.mxu0 %vm244_vm1, %v208_v23  ;;  %906 = vmatprep.mubr.msk.f32.mxu1 %vm244_vm1, %v224_v24 }
  0x2d   : > { %883 = vmatmul.mubr.msk.f32.gmra.mrb[8].mxu0 %vm244_vm1, %v209_v25  ;;  %907 = vmatmul.mubr.msk.f32.gmra.mrb[8].mxu1 %vm244_vm1, %v225_v26 }
  0x2e   : > { %885 = vmatprep.mubr.msk.f32.mxu0 %vm244_vm1, %v210_v27  ;;  %909 = vmatprep.mubr.msk.f32.mxu1 %vm244_vm1, %v226_v28 }
  0x31   : > { %886 = vmatmul.mubr.msk.f32.gmra.mrb[10].mxu0 %vm244_vm1, %v211_v29  ;;  %910 = vmatmul.mubr.msk.f32.gmra.mrb[10].mxu1 %vm244_vm1, %v227_v30 }
  0x32   : > { %888 = vmatprep.mubr.msk.f32.mxu0 %vm244_vm1, %v212_v31  ;;  %912 = vmatprep.mubr.msk.f32.mxu1 %vm244_vm1, %v228_v32 }
  0x35   : > { %889 = vmatmul.mubr.msk.f32.gmra.mrb[12].mxu0 %vm244_vm1, %v213_v33  ;;  %913 = vmatmul.mubr.msk.f32.gmra.mrb[12].mxu1 %vm244_vm1, %v229_v34 }
  0x36   : > { %891 = vmatprep.mubr.msk.f32.mxu0 %vm244_vm1, %v214_v35  ;;  %915 = vmatprep.mubr.msk.f32.mxu1 %vm244_vm1, %v230_v36 }
  0x39   : > { %892 = vmatmul.mubr.msk.f32.gmra.mrb[14].mxu0 %vm244_vm1, %v215_v37  ;;  %916 = vmatmul.mubr.msk.f32.gmra.mrb[14].mxu1 %vm244_vm1, %v231_v38 }
  0xf0   : > { %v872_v40 = vpop.f32.mrb[0].mxu0  ;;  %v896_v42 = vpop.f32.mrb[0].mxu1 }
  0xf1   : > { %v417_v43 = vadd.f32 %v872_v40, %v1209_v39  ;;  %v497_v44 = vadd.f32 %v896_v42, %v1209_v39  ;;  %v411_v45 = vpop.f32.mrb[1].mxu0  ;;  %v491_v46 = vpop.f32.mrb[1].mxu1 }
  0xf2   : > { %v412_v47 = vadd.f32 %v1209_v39, %v411_v45  ;;  %v492_v48 = vadd.f32 %v1209_v39, %v491_v46 }
  0xf3   : > { %vm572_vm2 = vcmp.ge.f32.partialorder %v417_v43, 0.0  ;;  %v605_v49 = vmul.f32 %v1213_v41, %v417_v43  ;;  %vm588_vm3 = vcmp.ge.f32.partialorder %v497_v44, 0.0  ;;  %v621_v50 = vmul.f32 %v1213_v41, %v497_v44 }
  0xf4   : > { %vm571_vm4 = vcmp.ge.f32.partialorder %v412_v47, 0.0  ;;  %v604_v51 = vmul.f32 %v1213_v41, %v412_v47  ;;  %vm587_vm5 = vcmp.ge.f32.partialorder %v492_v48, 0.0  ;;  %v620_v52 = vmul.f32 %v1213_v41, %v492_v48  ;;  %v875_v53 = vpop.f32.mrb[2].mxu0  ;;  %v899_v54 = vpop.f32.mrb[2].mxu1 }
  0xf5   : > { %v637_v55 = vsel %vm572_vm2, %v417_v43, %v605_v49  ;;  %v653_v56 = vsel %vm588_vm3, %v497_v44, %v621_v50  ;;  %v427_v57 = vadd.f32 %v875_v53, %v1209_v39  ;;  %v507_v58 = vadd.f32 %v899_v54, %v1209_v39  ;;  %v421_v59 = vpop.f32.mrb[3].mxu0  ;;  %v501_v60 = vpop.f32.mrb[3].mxu1 }
  0xf6   : > { %669 = vst [vmem:[%s1225_s30 + $0x8] sm:$0xff] %v637_v55  ;;  %685 = vst [vmem:[%s1225_s30 + $0x88] sm:$0xff] %v653_v56  ;;  %v636_v61 = vsel %vm571_vm4, %v412_v47, %v604_v51  ;;  %v652_v62 = vsel %vm587_vm5, %v492_v48, %v620_v52  ;;  %v422_v63 = vadd.f32 %v1209_v39, %v421_v59 }
  0xf7   : > { %v502_v0 = vadd.f32 %v1209_v39, %v501_v60  ;;  %668 = vst [vmem:[%s1225_s30] sm:$0xff] %v636_v61  ;;  %684 = vst [vmem:[%s1225_s30 + $0x80] sm:$0xff] %v652_v62  ;;  %vm574_vm6 = vcmp.ge.f32.partialorder %v427_v57, 0.0  ;;  %v607_v1 = vmul.f32 %v1213_v41, %v427_v57  ;;  %vm590_vm7 = vcmp.ge.f32.partialorder %v507_v58, 0.0 }
  0xf8   : > { %v623_v2 = vmul.f32 %v1213_v41, %v507_v58  ;;  %vm573_vm8 = vcmp.ge.f32.partialorder %v422_v63, 0.0  ;;  %v606_v3 = vmul.f32 %v1213_v41, %v422_v63  ;;  %v878_v5 = vpop.f32.mrb[4].mxu0  ;;  %v902_v6 = vpop.f32.mrb[4].mxu1 }
  0xf9   : > { %vm589_vm9 = vcmp.ge.f32.partialorder %v502_v0, 0.0  ;;  %v622_v4 = vmul.f32 %v1213_v41, %v502_v0  ;;  %v639_v7 = vsel %vm574_vm6, %v427_v57, %v607_v1  ;;  %v437_v9 = vadd.f32 %v878_v5, %v1209_v39  ;;  %v431_v11 = vpop.f32.mrb[5].mxu0  ;;  %v511_v12 = vpop.f32.mrb[5].mxu1 }
  0xfa   : > { %v655_v8 = vsel %vm590_vm7, %v507_v58, %v623_v2  ;;  %v517_v10 = vadd.f32 %v902_v6, %v1209_v39  ;;  %671 = vst [vmem:[%s1225_s30 + $0x18] sm:$0xff] %v639_v7  ;;  %v638_v13 = vsel %vm573_vm8, %v422_v63, %v606_v3  ;;  %v432_v15 = vadd.f32 %v1209_v39, %v431_v11 }
  0xfb   : > { %687 = vst [vmem:[%s1225_s30 + $0x98] sm:$0xff] %v655_v8  ;;  %v654_v14 = vsel %vm589_vm9, %v502_v0, %v622_v4  ;;  %v512_v16 = vadd.f32 %v1209_v39, %v511_v12  ;;  %670 = vst [vmem:[%s1225_s30 + $0x10] sm:$0xff] %v638_v13  ;;  %vm576_vm10 = vcmp.ge.f32.partialorder %v437_v9, 0.0  ;;  %v609_v17 = vmul.f32 %v1213_v41, %v437_v9 }
  0xfc   : > { %686 = vst [vmem:[%s1225_s30 + $0x90] sm:$0xff] %v654_v14  ;;  %vm592_vm11 = vcmp.ge.f32.partialorder %v517_v10, 0.0  ;;  %v625_v18 = vmul.f32 %v1213_v41, %v517_v10  ;;  %vm575_vm12 = vcmp.ge.f32.partialorder %v432_v15, 0.0  ;;  %v608_v19 = vmul.f32 %v1213_v41, %v432_v15  ;;  %v881_v21 = vpop.f32.mrb[6].mxu0  ;;  %v905_v22 = vpop.f32.mrb[6].mxu1 }
  0xfd   : > { %vm591_vm13 = vcmp.ge.f32.partialorder %v512_v16, 0.0  ;;  %v624_v20 = vmul.f32 %v1213_v41, %v512_v16  ;;  %v641_v23 = vsel %vm576_vm10, %v437_v9, %v609_v17  ;;  %v447_v25 = vadd.f32 %v881_v21, %v1209_v39  ;;  %v441_v27 = vpop.f32.mrb[7].mxu0  ;;  %v521_v28 = vpop.f32.mrb[7].mxu1 }
  0xfe   : > { %v657_v24 = vsel %vm592_vm11, %v517_v10, %v625_v18  ;;  %v527_v26 = vadd.f32 %v905_v22, %v1209_v39  ;;  %673 = vst [vmem:[%s1225_s30 + $0x28] sm:$0xff] %v641_v23  ;;  %v640_v29 = vsel %vm575_vm12, %v432_v15, %v608_v19  ;;  %v442_v31 = vadd.f32 %v1209_v39, %v441_v27 }
  0xff   : > { %689 = vst [vmem:[%s1225_s30 + $0xa8] sm:$0xff] %v657_v24  ;;  %v656_v30 = vsel %vm591_vm13, %v512_v16, %v624_v20  ;;  %v522_v32 = vadd.f32 %v1209_v39, %v521_v28  ;;  %672 = vst [vmem:[%s1225_s30 + $0x20] sm:$0xff] %v640_v29  ;;  %vm578_vm14 = vcmp.ge.f32.partialorder %v447_v25, 0.0  ;;  %v611_v33 = vmul.f32 %v1213_v41, %v447_v25 }
 0x100   : > { %688 = vst [vmem:[%s1225_s30 + $0xa0] sm:$0xff] %v656_v30  ;;  %vm594_vm15 = vcmp.ge.f32.partialorder %v527_v26, 0.0  ;;  %v627_v34 = vmul.f32 %v1213_v41, %v527_v26  ;;  %vm577_vm0 = vcmp.ge.f32.partialorder %v442_v31, 0.0  ;;  %v610_v35 = vmul.f32 %v1213_v41, %v442_v31  ;;  %v884_v37 = vpop.f32.mrb[8].mxu0  ;;  %v908_v38 = vpop.f32.mrb[8].mxu1 }
 0x101   : > { %vm593_vm1 = vcmp.ge.f32.partialorder %v522_v32, 0.0  ;;  %v626_v36 = vmul.f32 %v1213_v41, %v522_v32  ;;  %v643_v40 = vsel %vm578_vm14, %v447_v25, %v611_v33  ;;  %v457_v43 = vadd.f32 %v884_v37, %v1209_v39  ;;  %v451_v45 = vpop.f32.mrb[9].mxu0  ;;  %v531_v46 = vpop.f32.mrb[9].mxu1 }
 0x102   : > { %v659_v42 = vsel %vm594_vm15, %v527_v26, %v627_v34  ;;  %v537_v44 = vadd.f32 %v908_v38, %v1209_v39  ;;  %675 = vst [vmem:[%s1225_s30 + $0x38] sm:$0xff] %v643_v40  ;;  %v642_v47 = vsel %vm577_vm0, %v442_v31, %v610_v35  ;;  %v452_v49 = vadd.f32 %v1209_v39, %v451_v45 }
 0x103   : > { %691 = vst [vmem:[%s1225_s30 + $0xb8] sm:$0xff] %v659_v42  ;;  %v658_v48 = vsel %vm593_vm1, %v522_v32, %v626_v36  ;;  %v532_v50 = vadd.f32 %v1209_v39, %v531_v46  ;;  %674 = vst [vmem:[%s1225_s30 + $0x30] sm:$0xff] %v642_v47  ;;  %vm580_vm2 = vcmp.ge.f32.partialorder %v457_v43, 0.0  ;;  %v613_v51 = vmul.f32 %v1213_v41, %v457_v43 }
 0x104   : > { %690 = vst [vmem:[%s1225_s30 + $0xb0] sm:$0xff] %v658_v48  ;;  %vm596_vm3 = vcmp.ge.f32.partialorder %v537_v44, 0.0  ;;  %v629_v52 = vmul.f32 %v1213_v41, %v537_v44  ;;  %vm579_vm4 = vcmp.ge.f32.partialorder %v452_v49, 0.0  ;;  %v612_v53 = vmul.f32 %v1213_v41, %v452_v49  ;;  %v887_v55 = vpop.f32.mrb[10].mxu0  ;;  %v911_v56 = vpop.f32.mrb[10].mxu1 }
 0x105   : > { %vm595_vm5 = vcmp.ge.f32.partialorder %v532_v50, 0.0  ;;  %v628_v54 = vmul.f32 %v1213_v41, %v532_v50  ;;  %v645_v57 = vsel %vm580_vm2, %v457_v43, %v613_v51  ;;  %v467_v59 = vadd.f32 %v887_v55, %v1209_v39  ;;  %v461_v61 = vpop.f32.mrb[11].mxu0  ;;  %v541_v62 = vpop.f32.mrb[11].mxu1 }
 0x106   : > { %v661_v58 = vsel %vm596_vm3, %v537_v44, %v629_v52  ;;  %v547_v60 = vadd.f32 %v911_v56, %v1209_v39  ;;  %677 = vst [vmem:[%s1225_s30 + $0x48] sm:$0xff] %v645_v57  ;;  %v644_v63 = vsel %vm579_vm4, %v452_v49, %v612_v53  ;;  %v462_v1 = vadd.f32 %v1209_v39, %v461_v61 }
 0x107   : > { %693 = vst [vmem:[%s1225_s30 + $0xc8] sm:$0xff] %v661_v58  ;;  %v660_v0 = vsel %vm595_vm5, %v532_v50, %v628_v54  ;;  %v542_v2 = vadd.f32 %v1209_v39, %v541_v62  ;;  %676 = vst [vmem:[%s1225_s30 + $0x40] sm:$0xff] %v644_v63  ;;  %vm582_vm6 = vcmp.ge.f32.partialorder %v467_v59, 0.0  ;;  %v615_v3 = vmul.f32 %v1213_v41, %v467_v59 }
 0x108   : > { %692 = vst [vmem:[%s1225_s30 + $0xc0] sm:$0xff] %v660_v0  ;;  %vm598_vm7 = vcmp.ge.f32.partialorder %v547_v60, 0.0  ;;  %v631_v4 = vmul.f32 %v1213_v41, %v547_v60  ;;  %vm581_vm8 = vcmp.ge.f32.partialorder %v462_v1, 0.0  ;;  %v614_v5 = vmul.f32 %v1213_v41, %v462_v1  ;;  %v890_v7 = vpop.f32.mrb[12].mxu0  ;;  %v914_v8 = vpop.f32.mrb[12].mxu1 }
 0x109   : > { %vm597_vm9 = vcmp.ge.f32.partialorder %v542_v2, 0.0  ;;  %v630_v6 = vmul.f32 %v1213_v41, %v542_v2  ;;  %v647_v9 = vsel %vm582_vm6, %v467_v59, %v615_v3  ;;  %v477_v11 = vadd.f32 %v890_v7, %v1209_v39  ;;  %v471_v13 = vpop.f32.mrb[13].mxu0  ;;  %v551_v14 = vpop.f32.mrb[13].mxu1 }
 0x10a   : > { %v663_v10 = vsel %vm598_vm7, %v547_v60, %v631_v4  ;;  %v557_v12 = vadd.f32 %v914_v8, %v1209_v39  ;;  %679 = vst [vmem:[%s1225_s30 + $0x58] sm:$0xff] %v647_v9  ;;  %v646_v15 = vsel %vm581_vm8, %v462_v1, %v614_v5  ;;  %v472_v17 = vadd.f32 %v1209_v39, %v471_v13 }
 0x10b   : > { %695 = vst [vmem:[%s1225_s30 + $0xd8] sm:$0xff] %v663_v10  ;;  %v662_v16 = vsel %vm597_vm9, %v542_v2, %v630_v6  ;;  %v552_v18 = vadd.f32 %v1209_v39, %v551_v14  ;;  %678 = vst [vmem:[%s1225_s30 + $0x50] sm:$0xff] %v646_v15  ;;  %vm584_vm10 = vcmp.ge.f32.partialorder %v477_v11, 0.0  ;;  %v617_v19 = vmul.f32 %v1213_v41, %v477_v11 }
 0x10c   : > { %694 = vst [vmem:[%s1225_s30 + $0xd0] sm:$0xff] %v662_v16  ;;  %vm600_vm11 = vcmp.ge.f32.partialorder %v557_v12, 0.0  ;;  %v633_v20 = vmul.f32 %v1213_v41, %v557_v12  ;;  %vm583_vm12 = vcmp.ge.f32.partialorder %v472_v17, 0.0  ;;  %v616_v21 = vmul.f32 %v1213_v41, %v472_v17  ;;  %v893_v23 = vpop.f32.mrb[14].mxu0  ;;  %v917_v24 = vpop.f32.mrb[14].mxu1 }
 0x10d   : > { %vm599_vm13 = vcmp.ge.f32.partialorder %v552_v18, 0.0  ;;  %v632_v22 = vmul.f32 %v1213_v41, %v552_v18  ;;  %v649_v25 = vsel %vm584_vm10, %v477_v11, %v617_v19  ;;  %v487_v27 = vadd.f32 %v893_v23, %v1209_v39  ;;  %v481_v29 = vpop.f32.mrb[15].mxu0  ;;  %v561_v30 = vpop.f32.mrb[15].mxu1 }
 0x10e   : > { %v665_v26 = vsel %vm600_vm11, %v557_v12, %v633_v20  ;;  %v567_v28 = vadd.f32 %v917_v24, %v1209_v39  ;;  %681 = vst [vmem:[%s1225_s30 + $0x68] sm:$0xff] %v649_v25  ;;  %v648_v31 = vsel %vm583_vm12, %v472_v17, %v616_v21  ;;  %v482_v33 = vadd.f32 %v1209_v39, %v481_v29 }
 0x10f   : > { %697 = vst [vmem:[%s1225_s30 + $0xe8] sm:$0xff] %v665_v26  ;;  %v664_v32 = vsel %vm599_vm13, %v552_v18, %v632_v22  ;;  %v562_v34 = vadd.f32 %v1209_v39, %v561_v30  ;;  %680 = vst [vmem:[%s1225_s30 + $0x60] sm:$0xff] %v648_v31  ;;  %vm586_vm14 = vcmp.ge.f32.partialorder %v487_v27, 0.0  ;;  %v619_v35 = vmul.f32 %v1213_v41, %v487_v27 }
 0x110   : > { %696 = vst [vmem:[%s1225_s30 + $0xe0] sm:$0xff] %v664_v32  ;;  %vm602_vm15 = vcmp.ge.f32.partialorder %v567_v28, 0.0  ;;  %v635_v36 = vmul.f32 %v1213_v41, %v567_v28  ;;  %vm585_vm0 = vcmp.ge.f32.partialorder %v482_v33, 0.0  ;;  %v618_v37 = vmul.f32 %v1213_v41, %v482_v33 }
 0x111   : > { %vm601_vm1 = vcmp.ge.f32.partialorder %v562_v34, 0.0  ;;  %v634_v38 = vmul.f32 %v1213_v41, %v562_v34  ;;  %v651_v39 = vsel %vm586_vm14, %v487_v27, %v619_v35 }
 0x112   : > { %v667_v40 = vsel %vm602_vm15, %v567_v28, %v635_v36  ;;  %683 = vst [vmem:[%s1225_s30 + $0x78] sm:$0xff] %v651_v39  ;;  %v650_v42 = vsel %vm585_vm0, %v482_v33, %v618_v37 }
 0x113   : > { %699 = vst [vmem:[%s1225_s30 + $0xf8] sm:$0xff] %v667_v40  ;;  %v666_v43 = vsel %vm601_vm1, %v562_v34, %v634_v38  ;;  %682 = vst [vmem:[%s1225_s30 + $0x70] sm:$0xff] %v650_v42 }
 0x114   : > { %698 = vst [vmem:[%s1225_s30 + $0xf0] sm:$0xff] %v666_v43 }
 0x115   : > { %986 = shalt.err (!%p983_p3)
}
 0x116   : > { %s987_s14 = scalar_lea.hbm %s1315_s8, 4096  ;;  %s991_s21 = scalar_lea.hbm %s1370_s4, 8192 }
 0x117   : > { %p988_p4 = scmp.ne.s32.totalorder %s1315_s8, %s987_s14  ;;  %p992_p9 = scmp.lt.u32.totalorder %s1315_s8, %s1370_s4 }
 0x118   : > { %p993_p10 = scmp.lt.u32.totalorder %s991_s21, %s987_s14  ;;  %p995_p12 = scmp.lt.u32.totalorder %s987_s14, %s1315_s8 }
 0x119   : > { %p989_p7 = pnand %p988_p4, %p1106_p5 }
 0x11a   : > { %p994_p11 = por %p993_p10, %p992_p9 }
 0x11b   : > { %p990_p8 = pneg %p989_p7 }
 0x11c   : > { %p996_p13 = por %p995_p12, %p994_p11 }
 0x11e   : > { %p997_p0 = pnand %p996_p13, %p990_p8 }
 0x120   : > { %1000 = shalt.err (!%p997_p0)
}
 0x121   : > { %s1038_s28 = smov 128   ;;  %s1039_s29 = smov 8  }
 0x122   : > { %932 = dma.vmem_to_hbm [thread:$0]  (%p1106_p5), %s1317_s6, 4096, %s1315_s8, %s1325_s9, %s1038_s28, %s1038_s28, %s1039_s29  }
 0x123 PF: > { %p938_p1 = scmp.ge.s32.totalorder %s1035_s20, 2  ;;  %s729_s30 = sand.u32 1, %s1023_s17  }
 0x124   : > { %s730_s5 = scalar_lea.sflag [#allocation4], %s729_s30 }
 0x125   : > { %p935_p2 = pnand %p938_p1, %p1110_p6 }
 0x127   : > { %1018 = dma.done.wait (!%p935_p2), %s730_s5, 4096  }
 0x128   : > { %1020 = vsyncadd (!%p935_p2), %s730_s5, 4294963200  ;;  %p15_p3 = scmp.ge.s32.totalorder %s1093_s22, 4   ;;  %s1373_s17 = smov %s1027_s18 }
 0x129   : > { %s1374_s18 = smov %s1031_s19  ;;  %s1375_s19 = smov %s1104_s25 }
 0x12a   : > { %s1376_s20 = smov %s1093_s22  ;;  %17 = sbr.rel (!%p15_p3) target bundleno = 5 (0x5), region = 71 }
 0x131   :  { %735 = vsyncpa [#allocation4], 1 }
 0x132   :  { %737 = vsyncpa [#allocation4 + $0x1], 1 }

</bundles_post_ra>
